<compile_context>
chip_gen: v6e
topology: v6e:2x2x1
jax: 0.10.0
libtpu: 0.0.40
codegen_flags: <defaults>
</compile_context>

<pallas_src>
import jax
import jax.numpy as jnp
from jax.experimental import pallas as pl
from jax.experimental.pallas import tpu as pltpu

_W3_ROWS = 8  # w3 row padded to 8 sublanes so the head matmul has M=8


def _round_up(x, m):
    return (x + m - 1) // m * m


def _cdiv(a, b):
    return -(-a // b)


def critic_kernel(x_ref, w1_ref, w2_ref, p_ref, o_ref):
    # p_ref rows: [0:8] = w3 row (row 0 real, rows 1-7 zero), [8] = b1, [9] = b2,
    #             [10] = b3 (only lane 0 used).
    # Layer 1: bf16 MXU dot, f32 accumulate, f32 bias + ReLU.
    x = x_ref[...].astype(jnp.bfloat16)
    h1 = jnp.dot(x, w1_ref[...], preferred_element_type=jnp.float32)
    h1 = jnp.maximum(h1 + p_ref[_W3_ROWS : _W3_ROWS + 1, :], 0.0)
    # TODO(synk): on v6e/v7x (bf16 VPU) the bias+ReLU epilogue could stay in bf16.

    # Layer 2: bf16 MXU dot, f32 accumulate, f32 bias + ReLU.
    h2 = jnp.dot(h1.astype(jnp.bfloat16), w2_ref[...],
                 preferred_element_type=jnp.float32)
    h2 = jnp.maximum(h2 + p_ref[_W3_ROWS + 1 : _W3_ROWS + 2, :], 0.0)

    # Output head (out_features == 1): contract the 256-feature axis of both operands
    # (same pattern as attention's q @ k.T) so the result is already lane-dense:
    # (8, 256) . (TB, 256)^T -> (8, TB); row 0 is the real head.
    v = jax.lax.dot_general(
        p_ref[0:_W3_ROWS, :], h2,
        dimension_numbers=(((1,), (1,)), ((), ())),
        preferred_element_type=jnp.float32)
    b3 = p_ref[_W3_ROWS + 2 : _W3_ROWS + 3, 0:1]          # (1, 1)
    o_ref[...] = (v[0:1, :] + b3).astype(o_ref.dtype)      # (1, TB) lane-dense store


def _choose_tile(batch, block_batch):
    """Rows per block and number of blocks.

    Lane-dense (1, TB) output blocks need TB % 128 == 0 unless a single block covers
    the whole (8-row padded) batch, in which case block == full array dims is legal.
    """
    if batch <= 128:
        return max(8, _round_up(batch, 8)), 1
    tb = _round_up(min(block_batch, batch), 128)
    nblk = _cdiv(batch, tb)
    if nblk < 2:
        # Force >= 2 blocks so ("parallel",) shards across both v7x TensorCores.
        tb = _round_up(_cdiv(batch, 2), 128)
        nblk = _cdiv(batch, tb)
    return tb, nblk


def prepare_critic_params(params):
    """One-time conversion of PyTorch-layout f32 params into kernel-ready arrays.
    Hoists all casts / reshapes / packing out of the per-call hot path."""
    hidden = params["w1"].shape[1]
    packed = jnp.zeros((_W3_ROWS + 3, hidden), jnp.float32)
    packed = packed.at[0].set(params["w3"].reshape(hidden))
    packed = packed.at[_W3_ROWS].set(params["b1"].reshape(hidden))
    packed = packed.at[_W3_ROWS + 1].set(params["b2"].reshape(hidden))
    packed = packed.at[_W3_ROWS + 2, 0].set(params["b3"].reshape(()))
    # TODO(synk): on v7x w2 could be stored fp8 (native MXU narrow type there).
    return {
        "w1": params["w1"].astype(jnp.bfloat16),   # bf16 MXU weights
        "w2": params["w2"].astype(jnp.bfloat16),
        "packed": packed,                          # small f32 params, one resident DMA
    }


def critic_forward(state, prepped, *, block_batch=2048):
    """state: (B, state_dim) f32; prepped: prepare_critic_params(...). Returns (B, 1) f32."""
    B, state_dim = state.shape
    w1, w2, packed = prepped["w1"], prepped["w2"], prepped["packed"]
    assert w1.shape[0] == state_dim

    TB, nblk = _choose_tile(B, block_batch)

    def resident(shape):
        # Same block every grid step -> stays VMEM-resident across the batch loop.
        return pl.BlockSpec(shape, lambda i: (0,) * len(shape))

    out = pl.pallas_call(
        critic_kernel,
        out_shape=jax.ShapeDtypeStruct((1, nblk * TB), jnp.float32),
        grid=(nblk,),
        in_specs=[
            pl.BlockSpec((TB, state_dim), lambda i: (i, 0)),   # batch-tiled input
            resident(w1.shape),
            resident(w2.shape),
            resident(packed.shape),
        ],
        out_specs=pl.BlockSpec((1, TB), lambda i: (0, i)),     # lane-dense output row
        compiler_params=pltpu.CompilerParams(
            dimension_semantics=("parallel",),                 # megacore sharding on v7x
        ),
    )(state, w1, w2, packed)

    # Block i wrote columns [i*TB, (i+1)*TB) -> row-major reshape preserves batch order.
    return out.reshape(-1, 1)[:B]


def init_critic_params(key, state_dim, hidden=256):
    """Matches PyTorch init_weights: Linear weights ~ N(0, 0.1), biases = 0.01.
    Weights stored as (in_features, out_features) so the forward computes x @ W + b."""
    k1, k2, k3 = jax.random.split(key, 3)
    return {
        "w1": 0.1 * jax.random.normal(k1, (state_dim, hidden), jnp.float32),
        "b1": jnp.full((1, hidden), 0.01, jnp.float32),
        "w2": 0.1 * jax.random.normal(k2, (hidden, hidden), jnp.float32),
        "b2": jnp.full((1, hidden), 0.01, jnp.float32),
        "w3": 0.1 * jax.random.normal(k3, (hidden, 1), jnp.float32),
        "b3": jnp.full((1, 1), 0.01, jnp.float32),
    }


def critic_reference(state, params, weight_dtype=jnp.float32):
    """Pure-JAX reference. weight_dtype=bf16 mirrors the kernel's mixed precision."""
    w1 = params["w1"].astype(weight_dtype)
    w2 = params["w2"].astype(weight_dtype)
    h1 = jnp.maximum(
        jnp.dot(state.astype(weight_dtype), w1,
                preferred_element_type=jnp.float32) + params["b1"], 0.0)
    h2 = jnp.maximum(
        jnp.dot(h1.astype(weight_dtype), w2,
                preferred_element_type=jnp.float32) + params["b2"], 0.0)
    v = jnp.dot(h2, params["w3"], precision=jax.lax.Precision.HIGHEST) + params["b3"]
    return v


if __name__ == "__main__":
    key = jax.random.PRNGKey(0)
    kx1, kx2, kp = jax.random.split(key, 3)

    state_dim = 32
    params = init_critic_params(kp, state_dim)
    prepped = prepare_critic_params(params)   # one-time weight prep (not per call)

    # Small RL-inference-style batch: single full block, grid=(1,).
    state = jax.random.normal(kx1, (8, state_dim), jnp.float32)
    value = jax.block_until_ready(critic_forward(state, prepped))
    assert value.shape == (8, 1)
    ref_bf16 = critic_reference(state, params, weight_dtype=jnp.bfloat16)
    assert jnp.allclose(value, ref_bf16, atol=2e-3, rtol=2e-3), "mismatch vs bf16 reference"
    ref_f32 = critic_reference(state, params, weight_dtype=jnp.float32)
    assert jnp.allclose(value, ref_f32, atol=5e-2, rtol=5e-2), "mismatch vs f32 reference"

    # Larger, non-divisible batch: multi-block grid (megacore path), ragged last block,
    # lane-dense tiled output.
    state2 = jax.random.normal(kx2, (300, state_dim), jnp.float32)
    value2 = jax.block_until_ready(critic_forward(state2, prepped))
    assert value2.shape == (300, 1)
    ref2_bf16 = critic_reference(state2, params, weight_dtype=jnp.bfloat16)
    assert jnp.allclose(value2, ref2_bf16, atol=2e-3, rtol=2e-3), "mismatch vs bf16 reference (B=300)"
    ref2_f32 = critic_reference(state2, params, weight_dtype=jnp.float32)
    assert jnp.allclose(value2, ref2_f32, atol=5e-2, rtol=5e-2), "mismatch vs f32 reference (B=300)"

    print("KERNEL_OK")
</pallas_src>

<mosaic_0001>
module attributes {stable_mosaic.version = 11 : i64} {
  func.func @critic_kernel(%arg0: i32, %arg1: memref<8x32xf32, #tpu.memory_space<vmem>>, %arg2: memref<32x256xbf16, #tpu.memory_space<vmem>>, %arg3: memref<256x256xbf16, #tpu.memory_space<vmem>>, %arg4: memref<11x256xf32, #tpu.memory_space<vmem>>, %arg5: memref<1x8xf32, #tpu.memory_space<vmem>>) attributes {dimension_semantics = [#tpu.dimension_semantics<parallel>], iteration_bounds = array<i64: 1>, scalar_prefetch = 0 : i64, scratch_operands = 0 : i64, tpu.core_type = #tpu.core_type<tc>, window_params = [{transform_indices = @transform_0, window_bounds = array<i64: 8, 32>}, {pipeline_mode = #tpu.pipeline_mode<synchronous>, transform_indices = @transform_1, window_bounds = array<i64: 32, 256>}, {pipeline_mode = #tpu.pipeline_mode<synchronous>, transform_indices = @transform_2, window_bounds = array<i64: 256, 256>}, {pipeline_mode = #tpu.pipeline_mode<synchronous>, transform_indices = @transform_3, window_bounds = array<i64: 11, 256>}, {transform_indices = @transform_4, window_bounds = array<i64: 1, 8>}]} {
    %c0 = arith.constant 0 : index
    %c0_0 = arith.constant 0 : index
    %0 = vector.load %arg1[%c0, %c0_0] : memref<8x32xf32, #tpu.memory_space<vmem>>, vector<8x32xf32>
    %1 = arith.truncf %0 : vector<8x32xf32> to vector<8x32xbf16>
    %c0_1 = arith.constant 0 : index
    %c0_2 = arith.constant 0 : index
    %2 = vector.load %arg2[%c0_1, %c0_2] : memref<32x256xbf16, #tpu.memory_space<vmem>>, vector<32x256xbf16>
    %cst = arith.constant dense<0.000000e+00> : vector<8x256xf32>
    %3 = tpu.matmul %1, %2, %cst {dimension_numbers = #tpu.dot_dimension_numbers<[1], [0], [0], [1], [0, 0, 1, 1], [], []>} : vector<8x32xbf16>, vector<32x256xbf16>, vector<8x256xf32> -> vector<8x256xf32>
    %c8 = arith.constant 8 : index
    %c0_3 = arith.constant 0 : index
    %4 = vector.load %arg4[%c8, %c0_3] : memref<11x256xf32, #tpu.memory_space<vmem>>, vector<1x256xf32>
    %5 = vector.broadcast %4 : vector<1x256xf32> to vector<8x256xf32>
    %6 = arith.addf %3, %5 : vector<8x256xf32>
    %cst_4 = arith.constant 0.000000e+00 : f32
    %7 = vector.broadcast %cst_4 : f32 to vector<8x256xf32>
    %8 = arith.maximumf %6, %7 : vector<8x256xf32>
    %9 = arith.truncf %8 : vector<8x256xf32> to vector<8x256xbf16>
    %c0_5 = arith.constant 0 : index
    %c0_6 = arith.constant 0 : index
    %10 = vector.load %arg3[%c0_5, %c0_6] : memref<256x256xbf16, #tpu.memory_space<vmem>>, vector<256x256xbf16>
    %cst_7 = arith.constant dense<0.000000e+00> : vector<8x256xf32>
    %11 = tpu.matmul %9, %10, %cst_7 {dimension_numbers = #tpu.dot_dimension_numbers<[1], [0], [0], [1], [0, 0, 1, 1], [], []>} : vector<8x256xbf16>, vector<256x256xbf16>, vector<8x256xf32> -> vector<8x256xf32>
    %c9 = arith.constant 9 : index
    %c0_8 = arith.constant 0 : index
    %12 = vector.load %arg4[%c9, %c0_8] : memref<11x256xf32, #tpu.memory_space<vmem>>, vector<1x256xf32>
    %13 = vector.broadcast %12 : vector<1x256xf32> to vector<8x256xf32>
    %14 = arith.addf %11, %13 : vector<8x256xf32>
    %cst_9 = arith.constant 0.000000e+00 : f32
    %15 = vector.broadcast %cst_9 : f32 to vector<8x256xf32>
    %16 = arith.maximumf %14, %15 : vector<8x256xf32>
    %c0_10 = arith.constant 0 : index
    %c0_11 = arith.constant 0 : index
    %17 = vector.load %arg4[%c0_10, %c0_11] : memref<11x256xf32, #tpu.memory_space<vmem>>, vector<8x256xf32>
    %cst_12 = arith.constant dense<0.000000e+00> : vector<8x8xf32>
    %18 = tpu.matmul %17, %16, %cst_12 {dimension_numbers = #tpu.dot_dimension_numbers<[1], [1], [0], [0], [0, 0, 1, 0], [], []>} : vector<8x256xf32>, vector<8x256xf32>, vector<8x8xf32> -> vector<8x8xf32>
    %c10 = arith.constant 10 : index
    %c0_13 = arith.constant 0 : index
    %19 = vector.load %arg4[%c10, %c0_13] : memref<11x256xf32, #tpu.memory_space<vmem>>, vector<1x1xf32>
    %20 = vector.extract_strided_slice %18 {offsets = [0, 0], sizes = [1, 8], strides = [1, 1]} : vector<8x8xf32> to vector<1x8xf32>
    %21 = vector.broadcast %19 : vector<1x1xf32> to vector<1x8xf32>
    %22 = arith.addf %20, %21 : vector<1x8xf32>
    %c0_14 = arith.constant 0 : index
    %c0_15 = arith.constant 0 : index
    %23 = vector.load %arg5[%c0_14, %c0_15] : memref<1x8xf32, #tpu.memory_space<vmem>>, vector<1x8xf32>
    tpu.vector_store %arg5[%c0_14, %c0_15], %22 {strides = array<i32>} : memref<1x8xf32, #tpu.memory_space<vmem>>, vector<1x8xf32>,
    return
  }
  func.func @transform_0(%arg0: i32) -> (i32, i32) {
    %c0_i32 = arith.constant 0 : i32
    %c0_i32_0 = arith.constant 0 : i32
    return %arg0, %c0_i32 : i32, i32
  }
  func.func @transform_1(%arg0: i32) -> (i32, i32) {
    %c0_i32 = arith.constant 0 : i32
    %c0_i32_0 = arith.constant 0 : i32
    %c0_i32_1 = arith.constant 0 : i32
    return %c0_i32, %c0_i32_0 : i32, i32
  }
  func.func @transform_2(%arg0: i32) -> (i32, i32) {
    %c0_i32 = arith.constant 0 : i32
    %c0_i32_0 = arith.constant 0 : i32
    %c0_i32_1 = arith.constant 0 : i32
    return %c0_i32, %c0_i32_0 : i32, i32
  }
  func.func @transform_3(%arg0: i32) -> (i32, i32) {
    %c0_i32 = arith.constant 0 : i32
    %c0_i32_0 = arith.constant 0 : i32
    %c0_i32_1 = arith.constant 0 : i32
    return %c0_i32, %c0_i32_0 : i32, i32
  }
  func.func @transform_4(%arg0: i32) -> (i32, i32) {
    %c0_i32 = arith.constant 0 : i32
    %c0_i32_0 = arith.constant 0 : i32
    return %c0_i32, %arg0 : i32, i32
  }
}

</mosaic_0001>

<bundles_post_ra>
// kernel: tpu_custom_call.1
= control target key start
LH: loop header
LB: loop body
LE: loop exit
PB: predicated region body
PF: predicated region fallthrough
CT: control target
= control target key end

     0   :  { %9 = vsyncpa [#allocation3], 0  ;;  %s766_s0 = inlined_call_operand.hbm [shape: f32[8,32], index: 0, kind: input, shape index: {}]   ;;  %s767_s1 = inlined_call_operand.hbm [shape: bf16[32,256], index: 1, kind: input, shape index: {}]   ;;  %s768_s2 = inlined_call_operand.hbm [shape: bf16[256,256], index: 2, kind: input, shape index: {}]   ;;  %s769_s3 = inlined_call_operand.hbm [shape: f32[11,256], index: 3, kind: input, shape index: {}]   ;;  %s770_s4 = inlined_call_operand.hbm [shape: f32[1,8], index: 4, kind: output, shape index: {}]  }
   0x1   :  { %10 = vsyncpa [#allocation6], 0 }
   0x2   :  { %11 = vsyncpa [#allocation9], 0 }
   0x3   :  { %12 = vsyncpa [#allocation4], 0  ;;  %s716_s15 = smov [#allocation5]  }
   0x4   :  { %s28_s16 = sshll.u32 %s716_s15, 4  ;;  %s29_s16 = int_to_ptr.vmem [resolvable:$true] %s28_s16 }
   0x5   :  { %s616_s17 = scalar_lea.vmem %s29_s16, 512  ;;  %p621_p1 = scmp.lt.s32.totalorder %s29_s16, %s29_s16 }
   0x6   :  { %p617_p0 = scmp.ne.s32.totalorder %s29_s16, %s616_s17  ;;  %p622_p2 = scmp.lt.s32.totalorder %s616_s17, %s616_s17 }
   0x8   :  { %p623_p3 = por %p622_p2, %p621_p1 }
   0xa   :  { %p624_p4 = pnand %p623_p3, %p617_p0 }
   0xc   :  { %627 = shalt.err (!%p624_p4)
}
   0xd   :  { %s717_s18 = smov 128   ;;  %s718_s19 = smov 8  }
   0xe   :  { %34 = dma.hbm_to_vmem [thread:$0]  %s767_s1, 512, %s29_s16, [#allocation6], %s717_s18, %s717_s18, %s718_s19  }
   0xf   :  { %s719_s22 = smov [#allocation2]   ;;  %s720_s24 = smov [#allocation7]  }
  0x10   :  { %s19_s23 = sshll.u32 %s719_s22, 4  ;;  %s40_s25 = sshll.u32 %s720_s24, 4  ;;  %s20_s23 = int_to_ptr.vmem [resolvable:$true] %s19_s23  ;;  %s41_s25 = int_to_ptr.vmem [resolvable:$true] %s40_s25 }
  0x11   :  { %s636_s26 = scalar_lea.vmem %s20_s23, 128  ;;  %p641_p6 = scmp.lt.s32.totalorder %s20_s23, %s20_s23 }
  0x12   :  { %p637_p5 = scmp.ne.s32.totalorder %s20_s23, %s636_s26  ;;  %p642_p7 = scmp.lt.s32.totalorder %s636_s26, %s636_s26 }
  0x14   :  { %p643_p8 = por %p642_p7, %p641_p6 }
  0x16   :  { %p644_p9 = pnand %p643_p8, %p637_p5 }
  0x18   :  { %647 = shalt.err (!%p644_p9)
}
  0x19   :  { %22 = dma.hbm_to_vmem [thread:$0]  %s766_s0, 128, %s20_s23, [#allocation3]  }
  0x1a   :  { %s656_s29 = scalar_lea.vmem %s41_s25, 4096  ;;  %p661_p11 = scmp.lt.s32.totalorder %s41_s25, %s41_s25 }
  0x1b   :  { %p657_p10 = scmp.ne.s32.totalorder %s41_s25, %s656_s29  ;;  %p662_p12 = scmp.lt.s32.totalorder %s656_s29, %s656_s29 }
  0x1d   :  { %p663_p13 = por %p662_p12, %p661_p11 }
  0x1f   :  { %p664_p0 = pnand %p663_p13, %p657_p10 }
  0x21   :  { %667 = shalt.err (!%p664_p0)
}
  0x22   :  { %46 = dma.hbm_to_vmem [thread:$0]  %s768_s2, 4096, %s41_s25, [#allocation6], %s717_s18, %s717_s18, %s718_s19  }
  0x23   :  { %s721_s5 = smov [#allocation8]  }
  0x24   :  { %s52_s6 = sshll.u32 %s721_s5, 4  ;;  %s53_s6 = int_to_ptr.vmem [resolvable:$true] %s52_s6 }
  0x25   :  { %s676_s7 = scalar_lea.vmem %s53_s6, 512  ;;  %p681_p2 = scmp.lt.s32.totalorder %s53_s6, %s53_s6 }
  0x26   :  { %p677_p1 = scmp.ne.s32.totalorder %s53_s6, %s676_s7  ;;  %p682_p3 = scmp.lt.s32.totalorder %s676_s7, %s676_s7 }
  0x28   :  { %p683_p4 = por %p682_p3, %p681_p2 }
  0x2a   :  { %p684_p5 = pnand %p683_p4, %p677_p1 }
  0x2c   :  { %687 = shalt.err (!%p684_p5)
}
  0x2d   :  { %s722_s0 = smov 256   ;;  %s723_s8 = smov 16  }
  0x2e   :  { %58 = dma.hbm_to_vmem [thread:$0]  %s769_s3, 512, %s53_s6, [#allocation9], %s722_s0, %s722_s0, %s723_s8  }
  0x2f   :  { %708 = dma.done.wait [#allocation3], 128  }
  0x30   :  { %709 = vsyncadd [#allocation3], 4294967168 }
  0x31   :  { %710 = dma.done.wait [#allocation6], 4608  }
  0x32   :  { %711 = vsyncadd [#allocation6], 4294962688 }
  0x33   :  { %712 = dma.done.wait [#allocation9], 512  }
  0x34   :  { %713 = vsyncadd [#allocation9], 4294966784  ;;  %v724_v0 = vmov 0   ;;  %v554_v1 = vld [vmem:[#allocation5 + $0x14] ss:$8 sps:$4 sm:$0xff]   ;;  %vm111_vm0 = vcmask 261120   ;;  %v81_v39 = vlaneseq }
  0x35   :  { %147 = vmatprep.mubr.bf16.mxu0 %v724_v0  ;;  %553 = vset.pattern.permute.xlu0 %v724_v0  ;;  %v556_v2 = vld [vmem:[#allocation5 + $0x10] ss:$8 sps:$4 sm:$0xff]   ;;  %v557_v3 = vld [vmem:[#allocation5 + $0x4] ss:$8 sps:$4 sm:$0xff]   ;;  %v559_v4 = vld [vmem:[#allocation5] ss:$8 sps:$4 sm:$0xff]  }
  0x36   :  { %127 = vmatprep.subr.bf16.mxu0 %v554_v1  ;;  %v72_v5 = vld [vmem:[#allocation2] sm:$0xff]  ;;  %v563_v8 = vld [vmem:[#allocation7 + $0x64] ss:$8 sps:$4 sm:$0xff]   ;;  %v565_v10 = vld [vmem:[#allocation7 + $0x60] ss:$8 sps:$4 sm:$0xff]   ;;  %v82_v40 = vshrl.u32 %v81_v39, 7 }
  0x37   :  { %128 = vmatpush1.bf16.msra.mxu0 %v556_v2  ;;  %v560_v6 = vld [vmem:[#allocation7 + $0x74] ss:$8 sps:$4 sm:$0xff]   ;;  %v562_v7 = vld [vmem:[#allocation7 + $0x70] ss:$8 sps:$4 sm:$0xff]   ;;  %v73_v9 = vpack.c.bf16 %v72_v5, %v72_v5  ;;  %v569_v13 = vld [vmem:[#allocation7 + $0x44] ss:$8 sps:$4 sm:$0xff]  }
  0x38   :  { %129 = vmatprep.subr.bf16.mxu0 %v557_v3  ;;  %365 = vmatprep.subr.bf16.mxu1 %v560_v6  ;;  %v566_v11 = vld [vmem:[#allocation7 + $0x54] ss:$8 sps:$4 sm:$0xff]   ;;  %v568_v12 = vld [vmem:[#allocation7 + $0x50] ss:$8 sps:$4 sm:$0xff]   ;;  %v571_v14 = vld [vmem:[#allocation7 + $0x40] ss:$8 sps:$4 sm:$0xff]  }
  0x39   :  { %366 = vmatpush1.bf16.msra.mxu1 %v562_v7  ;;  %v572_v15 = vld [vmem:[#allocation7 + $0x34] ss:$8 sps:$4 sm:$0xff]   ;;  %v574_v16 = vld [vmem:[#allocation7 + $0x30] ss:$8 sps:$4 sm:$0xff]   ;;  %v575_v17 = vld [vmem:[#allocation7 + $0x24] ss:$8 sps:$4 sm:$0xff]  }
  0x3a   :  { %367 = vmatprep.subr.bf16.mxu1 %v563_v8  ;;  %v577_v18 = vld [vmem:[#allocation7 + $0x20] ss:$8 sps:$4 sm:$0xff]   ;;  %v578_v19 = vld [vmem:[#allocation7 + $0x14] ss:$8 sps:$4 sm:$0xff]   ;;  %v580_v20 = vld [vmem:[#allocation7 + $0x10] ss:$8 sps:$4 sm:$0xff]  }
  0x3b   :  { %130 = vmatpush1.bf16.msra.mxu0 %v559_v4  ;;  %v581_v21 = vld [vmem:[#allocation7 + $0x4] ss:$8 sps:$4 sm:$0xff]   ;;  %v583_v22 = vld [vmem:[#allocation7] ss:$8 sps:$4 sm:$0xff]   ;;  %v584_v23 = vld [vmem:[#allocation7 + $0xf4] ss:$8 sps:$4 sm:$0xff]  }
  0x3c   :  { %v586_v24 = vld [vmem:[#allocation7 + $0xf0] ss:$8 sps:$4 sm:$0xff]   ;;  %v587_v25 = vld [vmem:[#allocation7 + $0xe4] ss:$8 sps:$4 sm:$0xff]   ;;  %v589_v26 = vld [vmem:[#allocation7 + $0xe0] ss:$8 sps:$4 sm:$0xff]  }
  0x3d   :  { %368 = vmatpush1.bf16.msra.mxu1 %v565_v10  ;;  %v590_v27 = vld [vmem:[#allocation7 + $0xd4] ss:$8 sps:$4 sm:$0xff]   ;;  %v592_v28 = vld [vmem:[#allocation7 + $0xd0] ss:$8 sps:$4 sm:$0xff]   ;;  %v593_v29 = vld [vmem:[#allocation7 + $0xc4] ss:$8 sps:$4 sm:$0xff]  }
  0x3e   :  { %510 = vmatmul.mubr.msk.bf16.vlgmr.msra.gmra.mxu0 %vm111_vm0, %v73_v9  ;;  %369 = vmatprep.subr.bf16.mxu1 %v566_v11  ;;  %v595_v30 = vld [vmem:[#allocation7 + $0xc0] ss:$8 sps:$4 sm:$0xff]   ;;  %v596_v31 = vld [vmem:[#allocation7 + $0xb4] ss:$8 sps:$4 sm:$0xff]   ;;  %v598_v32 = vld [vmem:[#allocation7 + $0xb0] ss:$8 sps:$4 sm:$0xff]  }
  0x3f   :  { %v599_v33 = vld [vmem:[#allocation7 + $0xa4] ss:$8 sps:$4 sm:$0xff]   ;;  %v601_v34 = vld [vmem:[#allocation7 + $0xa0] ss:$8 sps:$4 sm:$0xff]   ;;  %v602_v35 = vld [vmem:[#allocation7 + $0x94] ss:$8 sps:$4 sm:$0xff]  }
  0x40   :  { %v604_v36 = vld [vmem:[#allocation7 + $0x90] ss:$8 sps:$4 sm:$0xff]   ;;  %v605_v37 = vld [vmem:[#allocation7 + $0x84] ss:$8 sps:$4 sm:$0xff]   ;;  %v607_v38 = vld [vmem:[#allocation7 + $0x80] ss:$8 sps:$4 sm:$0xff]  }
  0x41   :  { %370 = vmatpush1.bf16.msra.mxu1 %v568_v12  ;;  %v83_v41 = vsub.s32 0, %v82_v40  ;;  %v79_v42 = vld [vmem:[#allocation8 + $0x10] ss:$8 sm:$0x3]  ;;  %v87_v43 = vsub.s32 1, %v82_v40  ;;  %v409_v56 = vld [vmem:[#allocation8 + $0x8] sm:$0xff] }
  0x42   :  { %371 = vmatprep.subr.bf16.mxu1 %v569_v13  ;;  %474 = vmatprep.mubr.f32.mxu0 %v409_v56  ;;  %v480_v57 = vld [vmem:[#allocation8 + $0x12] ss:$0 sm:$0xff]  ;;  %v193_v58 = vld [vmem:[#allocation8 + $0x11] ss:$8 sm:$0x3]  ;;  %v408_v5 = vld [vmem:[#allocation8] sm:$0xff] }
  0x43   :  { %v84_v44 = vrot.slane %v79_v42, %v83_v41  ;;  %v88_v45 = vrot.slane %v79_v42, %v87_v43  ;;  %483 = vperm.xlu0 %553, %v480_v57   ;;  %v198_v59 = vrot.slane %v193_v58, %v83_v41  ;;  %v202_v60 = vrot.slane %v193_v58, %v87_v43  ;;  %s725_s2 = smov [#allocation10]  }
  0x44   :  { %s495_s3 = sshll.u32 %s725_s2, 4  ;;  %vm487_vm1 = vcmask 57344   ;;  %s496_s3 = int_to_ptr.vmem [resolvable:$true] %s495_s3 }
  0x45   :  { %372 = vmatpush1.bf16.msra.mxu1 %v571_v14  ;;  %s688_s11 = scalar_lea.vmem %s496_s3, 16  ;;  %s692_s12 = scalar_lea.vmem %s496_s3, 32 }
  0x46   :  { %373 = vmatprep.subr.bf16.mxu1 %v572_v15  ;;  %p689_p6 = scmp.ne.s32.totalorder %s496_s3, %s688_s11  ;;  %p693_p7 = scmp.lt.s32.totalorder %s496_s3, %s496_s3 }
  0x47   :  { %p694_p8 = scmp.lt.s32.totalorder %s692_s12, %s688_s11 }
  0x49   :  { %374 = vmatpush1.bf16.msra.mxu1 %v574_v16  ;;  %p695_p9 = por %p694_p8, %p693_p7 }
  0x4a   :  { %375 = vmatprep.subr.bf16.mxu1 %v575_v17 }
  0x4b   :  { %p696_p10 = pnand %p695_p9, %p689_p6 }
  0x4d   :  { %376 = vmatpush1.bf16.msra.mxu1 %v577_v18 }
  0x4e   :  { %377 = vmatprep.subr.bf16.mxu1 %v578_v19 }
  0x51   :  { %378 = vmatpush1.bf16.msra.mxu1 %v580_v20 }
  0x52   :  { %379 = vmatprep.subr.bf16.mxu1 %v581_v21 }
  0x55   :  { %380 = vmatpush1.bf16.msra.mxu1 %v583_v22 }
  0x56   :  { %381 = vmatprep.subr.bf16.mxu1 %v584_v23 }
  0x59   :  { %382 = vmatpush2.bf16.msra.mxu1 %v586_v24 }
  0x5a   :  { %383 = vmatprep.subr.bf16.mxu1 %v587_v25 }
  0x5d   :  { %384 = vmatpush2.bf16.msra.mxu1 %v589_v26 }
  0x5e   :  { %385 = vmatprep.subr.bf16.mxu1 %v590_v27 }
  0x61   :  { %386 = vmatpush2.bf16.msra.mxu1 %v592_v28 }
  0x62   :  { %387 = vmatprep.subr.bf16.mxu1 %v593_v29 }
  0x65   :  { %388 = vmatpush2.bf16.msra.mxu1 %v595_v30 }
  0x66   :  { %389 = vmatprep.subr.bf16.mxu1 %v596_v31 }
  0x69   :  { %390 = vmatpush2.bf16.msra.mxu1 %v598_v32 }
  0x6a   :  { %391 = vmatprep.subr.bf16.mxu1 %v599_v33 }
  0x6d   :  { %392 = vmatpush2.bf16.msra.mxu1 %v601_v34 }
  0x6e   :  { %393 = vmatprep.subr.bf16.mxu1 %v602_v35 }
  0x71   :  { %394 = vmatpush2.bf16.msra.mxu1 %v604_v36 }
  0x72   :  { %395 = vmatprep.subr.bf16.mxu1 %v605_v37 }
  0x75   :  { %396 = vmatpush2.bf16.msra.mxu1 %v607_v38 }
  0xbe   :  { %v484_v6 = vpop.permute.xlu0 %483 }
  0xfe   :  { %v149_v46 = vpop.f32.mrf.mxu0 }
  0xff   :  { %v150_v47 = vadd.f32 %v149_v46, %v84_v44 }
 0x100   :  { %v151_v48 = vpop.f32.mrf.mxu0 }
 0x101   :  { %v152_v49 = vadd.f32 %v151_v48, %v88_v45  ;;  %v156_v50 = vmax.f32 %v150_v47, 0.0 }
 0x102   :  { %v153_v51 = vpop.f32.mrf.mxu0 }
 0x103   :  { %v157_v52 = vmax.f32 %v152_v49, 0.0  ;;  %v158_v55 = vpack.c.bf16 %v156_v50, %v156_v50 }
 0x104   :  { %v154_v53 = vpop.f32.mrf.mxu0 }
 0x105   :  { %v159_v54 = vpack.c.bf16 %v157_v52, %v157_v52 }
 0x107   :  { %397 = vmatprep.mubr.bf16.mxu1 %v159_v54 }
 0x108   :  { %398 = vmatmul.mubr.bf16.vlgmr.msra.gmra.mxu1 %v158_v55 }
 0x1c8   :  { %v399_v61 = vpop.f32.mrf.mxu1 }
 0x1c9   :  { %v400_v62 = vadd.f32 %v399_v61, %v198_v59 }
 0x1ca   :  { %v401_v63 = vpop.f32.mrf.mxu1 }
 0x1cb   :  { %v402_v0 = vadd.f32 %v401_v63, %v202_v60  ;;  %v406_v3 = vmax.f32 %v400_v62, 0.0 }
 0x1cc   :  { %v403_v1 = vpop.f32.mrf.mxu1 }
 0x1cd   :  { %v407_v2 = vmax.f32 %v402_v0, 0.0 }
 0x1ce   :  { %v404_v4 = vpop.f32.mrf.mxu1 }
 0x1cf   :  { %440 = vmatprep.subr.mxu0 %v407_v2 }
 0x1d0   :  { %441 = vmatpush1.xpose.msra.mxu0 %v406_v3 }
 0x1d3   :  { %475 = vmatmul.mubr.f32.vlgmr.msra.gmra.mxu0 %v408_v5 }
 0x293   :  { %v476_v7 = vpop.f32.mrf.mxu0 }
 0x294   :  { %v486_v8 = vadd.f32 %v484_v6, %v476_v7 }
 0x295   :  { %v478_v9 = vpop.f32.mrf.mxu0 }
 0x296   :  { %488 = vst.msk [vmem:[#allocation10] sm:$0x1] %vm487_vm1, %v486_v8 }
 0x297   :  { %699 = shalt.err (!%p696_p10)
}
 0x298   :  { %498 = dma.vmem_to_hbm [thread:$0]  %s496_s3, 16, %s770_s4, [#allocation4]  }
 0x299   :  { %714 = dma.done.wait [#allocation4], 16  }
 0x29a   :  { %715 = vsyncadd [#allocation4], 4294967280 }
 0x29b   :  { %502 = vsyncpa [#allocation3], 1 }
 0x29c   :  { %503 = vsyncpa [#allocation6], 1 }
 0x29d   :  { %504 = vsyncpa [#allocation9], 1 }
 0x29e   :  { %505 = vsyncpa [#allocation4], 1 }

</bundles_post_ra>
